<compile_context>
chip_gen: v6e
topology: v6e:2x2x1
jax: 0.10.0
libtpu: 0.0.40
codegen_flags: <defaults>
</compile_context>

<pallas_src>
import jax
import jax.numpy as jnp
from jax.experimental import pallas as pl
from jax.experimental.pallas import tpu as pltpu


# ----------------------------------------------------------------------------
# Kernel
# ----------------------------------------------------------------------------
def _make_kernel(compute_dtype):
    def kernel(params_ref, x_ref, o_ref):
        # params_ref lives in SMEM: [slope, bias] as f32 scalars.
        slope = params_ref[0].astype(compute_dtype)
        bias = params_ref[1].astype(compute_dtype)
        x = x_ref[...].astype(compute_dtype)
        o_ref[...] = (slope * x + bias).astype(o_ref.dtype)

    return kernel


# ----------------------------------------------------------------------------
# Helpers
# ----------------------------------------------------------------------------
def _chip_generation():
    """Best-effort TPU generation from device_kind; 0 if unknown."""
    try:
        kind = jax.devices()[0].device_kind.lower()
    except Exception:
        return 0
    if "v7" in kind or "tpu7" in kind or "7x" in kind:
        return 7
    for g in (6, 5, 4, 3):
        if f"v{g}" in kind:
            return g
    return 0


def _choose_lanes(n_elems):
    """Largest lane-dense width (multiple of 128) dividing n_elems exactly."""
    for cand in (1024, 512, 256, 128):
        if n_elems % cand == 0:
            return cand
    return 128  # unreachable: n_elems is always a multiple of 128 here


def _choose_block_rows(rows, lanes, itemsize, max_block_bytes, min_grid):
    """Largest block (multiple of 8 rows, or full extent) within budget,
    optionally capped so the grid has >= min_grid steps (v7x dual-TC)."""
    cap = max(8, (max_block_bytes // (lanes * itemsize)) // 8 * 8)
    if min_grid > 1 and rows >= 16:
        per_core = max(8, (pl.cdiv(rows, min_grid) // 8) * 8)
        cap = min(cap, per_core)
    if rows <= cap:
        if rows % 8 == 0 or rows <= 8:
            return rows                      # full extent (always legal)
        return max(8, (rows // 8) * 8)       # ragged last block handled by Pallas
    return cap


def _affine_jax(x, slope_f32, bias_f32):
    """Pure-JAX affine, preserving x's dtype (used for fast path / tails)."""
    return (slope_f32 * x.astype(jnp.float32) + bias_f32).astype(x.dtype)


# ----------------------------------------------------------------------------
# Wrapper
# ----------------------------------------------------------------------------
def parametric_linear(x, slope, bias, *, max_block_bytes=None, force_kernel=False):
    """slope * x + bias, elementwise, via a Pallas TPU kernel. Keeps x's dtype."""
    orig_shape = x.shape
    dtype = x.dtype
    total = x.size
    itemsize = jnp.dtype(dtype).itemsize

    slope_f32 = jnp.asarray(slope, jnp.float32)
    bias_f32 = jnp.asarray(bias, jnp.float32)

    gen = _chip_generation()

    # Small-input fast path: launch overhead dominates; let XLA fuse it.
    if (total * itemsize < (512 << 10) and not force_kernel) or total < 128:
        return _affine_jax(x, slope_f32, bias_f32).reshape(orig_shape)

    # Chip-aware block budget (bytes of ONE input block; out block is equal).
    if max_block_bytes is None:
        max_block_bytes = (4 << 20) if gen >= 6 else (2 << 20)

    # Compute dtype: native float math on v6e/v7x, f32 elsewhere (v5e VPU
    # has no bf16) and for non-float dtypes.
    if gen >= 6 and jnp.issubdtype(dtype, jnp.floating):
        compute_dtype = dtype
    else:
        compute_dtype = jnp.float32

    min_grid = 2 if gen >= 7 else 1

    params = jnp.stack([slope_f32, bias_f32])
    flat = x.reshape(-1)                      # contiguous reshape: free

    # Largest 128-divisible prefix goes through the kernel; tiny tail in JAX.
    main = (total // 128) * 128
    tail = total - main
    x_main = flat[:main] if tail else flat

    lanes = _choose_lanes(main)
    rows = main // lanes
    x2d = x_main.reshape(rows, lanes)

    block_rows = _choose_block_rows(rows, lanes, itemsize, max_block_bytes, min_grid)
    grid = (pl.cdiv(rows, block_rows),)

    # Scoped VMEM: double-buffered in + out blocks, plus slack.
    block_bytes = block_rows * lanes * itemsize
    vmem_limit = int(min(max(4 * block_bytes + (4 << 20), 16 << 20), 48 << 20))

    out2d = pl.pallas_call(
        _make_kernel(compute_dtype),
        out_shape=jax.ShapeDtypeStruct((rows, lanes), dtype),
        grid_spec=pltpu.PrefetchScalarGridSpec(
            num_scalar_prefetch=0,
            grid=grid,
            in_specs=[
                # Scalar params: whole (2,) array in SMEM every step.
                pl.BlockSpec(memory_space=pltpu.MemorySpace.SMEM),
                # Large lane-dense tile of the input.
                pl.BlockSpec((block_rows, lanes), lambda i: (i, 0)),
            ],
            out_specs=pl.BlockSpec((block_rows, lanes), lambda i: (i, 0)),
        ),
        compiler_params=pltpu.CompilerParams(
            dimension_semantics=("parallel",),
            vmem_limit_bytes=vmem_limit,
        ),
    )(params, x2d)

    out_flat = out2d.reshape(-1)
    if tail:
        tail_out = _affine_jax(flat[main:], slope_f32, bias_f32)
        out_flat = jnp.concatenate([out_flat, tail_out])
    return out_flat.reshape(orig_shape)


def parametric_linear_ref(x, slope, bias):
    """Pure-JAX reference mirroring the PyTorch forward exactly."""
    return (jnp.asarray(slope, jnp.float32) * x.astype(jnp.float32)
            + jnp.asarray(bias, jnp.float32)).astype(x.dtype)


# ----------------------------------------------------------------------------
# Self-test
# ----------------------------------------------------------------------------
if __name__ == "__main__":
    key = jax.random.PRNGKey(0)
    # Small NCHW input consistent with a conv-style model input.
    x = jax.random.normal(key, (2, 4, 16, 16), dtype=jnp.float32) * 3.0
    slope, bias = 1.7, -0.3

    ref = parametric_linear_ref(x, slope, bias)

    # 1) Pallas kernel path (forced, since this test input is tiny).
    out = jax.block_until_ready(parametric_linear(x, slope, bias, force_kernel=True))
    assert out.shape == x.shape and out.dtype == x.dtype
    assert jnp.allclose(out, ref, atol=1e-6, rtol=1e-6)

    # 2) Small-input fast path (pure JAX).
    out_fast = jax.block_until_ready(parametric_linear(x, slope, bias))
    assert jnp.allclose(out_fast, ref, atol=1e-6, rtol=1e-6)

    # 3) Native bf16 compute path (f32 compute on v5e/unknown chips).
    x_bf16 = x.astype(jnp.bfloat16)
    out_bf16 = jax.block_until_ready(
        parametric_linear(x_bf16, slope, bias, force_kernel=True))
    ref_bf16 = parametric_linear_ref(x_bf16, slope, bias)
    assert out_bf16.dtype == jnp.bfloat16
    assert jnp.allclose(out_bf16.astype(jnp.float32),
                        ref_bf16.astype(jnp.float32), atol=2e-2, rtol=2e-2)

    # 4) Non-128-divisible size: kernel on prefix, plain-JAX tail.
    x_odd = jax.random.normal(jax.random.PRNGKey(1), (3, 5, 7, 11), dtype=jnp.float32)
    out_odd = jax.block_until_ready(
        parametric_linear(x_odd, slope, bias, force_kernel=True))
    ref_odd = parametric_linear_ref(x_odd, slope, bias)
    assert out_odd.shape == x_odd.shape
    assert jnp.allclose(out_odd, ref_odd, atol=1e-6, rtol=1e-6)

    print("KERNEL_OK")
</pallas_src>

<mosaic_0001>
module attributes {stable_mosaic.version = 11 : i64} {
  func.func @kernel(%arg0: i32, %arg1: memref<2xf32, #tpu.memory_space<smem>>, %arg2: memref<2x1024xf32, #tpu.memory_space<vmem>>, %arg3: memref<2x1024xf32, #tpu.memory_space<vmem>>) attributes {dimension_semantics = [#tpu.dimension_semantics<parallel>], iteration_bounds = array<i64: 1>, scalar_prefetch = 0 : i64, scratch_operands = 0 : i64, tpu.core_type = #tpu.core_type<tc>, window_params = [{transform_indices = @transform_0, window_bounds = array<i64: 2>}, {transform_indices = @transform_1, window_bounds = array<i64: 2, 1024>}, {transform_indices = @transform_2, window_bounds = array<i64: 2, 1024>}]} {
    %c0 = arith.constant 0 : index
    %0 = memref.load %arg1[%c0] : memref<2xf32, #tpu.memory_space<smem>>
    %c1 = arith.constant 1 : index
    %1 = memref.load %arg1[%c1] : memref<2xf32, #tpu.memory_space<smem>>
    %c0_0 = arith.constant 0 : index
    %c0_1 = arith.constant 0 : index
    %2 = vector.load %arg2[%c0_0, %c0_1] : memref<2x1024xf32, #tpu.memory_space<vmem>>, vector<2x1024xf32>
    %3 = vector.broadcast %0 : f32 to vector<2x1024xf32>
    %4 = arith.mulf %3, %2 : vector<2x1024xf32>
    %5 = vector.broadcast %1 : f32 to vector<2x1024xf32>
    %6 = arith.addf %4, %5 : vector<2x1024xf32>
    %c0_2 = arith.constant 0 : index
    %c0_3 = arith.constant 0 : index
    %7 = vector.load %arg3[%c0_2, %c0_3] : memref<2x1024xf32, #tpu.memory_space<vmem>>, vector<2x1024xf32>
    tpu.vector_store %arg3[%c0_2, %c0_3], %6 {strides = array<i32>} : memref<2x1024xf32, #tpu.memory_space<vmem>>, vector<2x1024xf32>,
    return
  }
  func.func @transform_0(%arg0: i32) -> i32 {
    %c0_i32 = arith.constant 0 : i32
    %c0_i32_0 = arith.constant 0 : i32
    return %c0_i32 : i32
  }
  func.func @transform_1(%arg0: i32) -> (i32, i32) {
    %c0_i32 = arith.constant 0 : i32
    %c0_i32_0 = arith.constant 0 : i32
    return %arg0, %c0_i32 : i32, i32
  }
  func.func @transform_2(%arg0: i32) -> (i32, i32) {
    %c0_i32 = arith.constant 0 : i32
    %c0_i32_0 = arith.constant 0 : i32
    return %arg0, %c0_i32 : i32, i32
  }
}

</mosaic_0001>

<bundles_post_ra>
// kernel: tpu_custom_call.1
= control target key start
LH: loop header
LB: loop body
LE: loop exit
PB: predicated region body
PF: predicated region fallthrough
CT: control target
= control target key end

     0   :  { %7 = vsyncpa [#allocation5], 0  ;;  %s148_s0 = inlined_call_operand.hbm [shape: f32[2], index: 0, kind: input, shape index: {}]   ;;  %s149_s1 = inlined_call_operand.hbm [shape: f32[2,1024], index: 1, kind: input, shape index: {}]   ;;  %s150_s2 = inlined_call_operand.hbm [shape: f32[2,1024], index: 2, kind: output, shape index: {}]  }
   0x1   :  { %8 = vsyncpa [#allocation3], 0 }
   0x2   :  { %9 = vsyncpa [#allocation4], 0  ;;  %s121_s9 = smov [#allocation2]   ;;  %s122_s12 = smov [#allocation6]  }
   0x3   :  { %17 = dma.hbm_to_smem %s148_s0, 16, %s121_s9, [#allocation5]  }
   0x4   :  { %s24_s13 = sshll.u32 %s122_s12, 4  ;;  %s25_s13 = int_to_ptr.vmem [resolvable:$true] %s24_s13 }
   0x5   :  { %s83_s14 = scalar_lea.vmem %s25_s13, 256  ;;  %p88_p1 = scmp.lt.s32.totalorder %s25_s13, %s25_s13 }
   0x6   :  { %p84_p0 = scmp.ne.s32.totalorder %s25_s13, %s83_s14  ;;  %p89_p2 = scmp.lt.s32.totalorder %s83_s14, %s83_s14 }
   0x8   :  { %p90_p3 = por %p89_p2, %p88_p1 }
   0xa   :  { %p91_p4 = pnand %p90_p3, %p84_p0 }
   0xc   :  { %94 = shalt.err (!%p91_p4)
}
   0xd   :  { %27 = dma.hbm_to_vmem [thread:$0]  %s149_s1, 256, %s25_s13, [#allocation3]  }
   0xe   :  { %115 = dma.done.wait [#allocation5], 16  }
   0xf   :  { %116 = vsyncadd [#allocation5], 4294967280 }
  0x10   :  { %117 = dma.done.wait [#allocation3], 256  }
  0x11   :  { %118 = vsyncadd [#allocation3], 4294967040 }
  0x12   :  { %34 = sfence }
  0x13   :  { %s35_s0 = sld [smem:[#allocation2]]  ;;  %v37_v0 = vld [vmem:[#allocation6] sm:$0xff]  ;;  %v38_v1 = vld [vmem:[#allocation6 + $0x8] sm:$0xff]  ;;  %s123_s18 = smov [#allocation7]  }
  0x14   :  { %s63_s17 = sld [smem:[#allocation2 + $0x1]]  ;;  %s53_s19 = sshll.u32 %s123_s18, 4  ;;  %s54_s19 = int_to_ptr.vmem [resolvable:$true] %s53_s19 }
  0x15   :  { %s95_s1 = scalar_lea.vmem %s54_s19, 256  ;;  %p100_p6 = scmp.lt.s32.totalorder %s54_s19, %s54_s19 }
  0x16   :  { %p96_p5 = scmp.ne.s32.totalorder %s54_s19, %s95_s1  ;;  %p101_p7 = scmp.lt.s32.totalorder %s95_s1, %s95_s1 }
  0x18   :  { %p102_p8 = por %p101_p7, %p100_p6 }
  0x19   :  { %v39_v2 = vstv %s35_s0 }
  0x1a   :  { %v40_v3 = vmul.f32 %v39_v2, %v37_v0  ;;  %v42_v4 = vstv %s63_s17  ;;  %v41_v5 = vmul.f32 %v39_v2, %v38_v1  ;;  %p103_p9 = pnand %p102_p8, %p96_p5 }
  0x1c   :  { %v43_v6 = vadd.f32 %v42_v4, %v40_v3  ;;  %v44_v7 = vadd.f32 %v42_v4, %v41_v5 }
  0x1e   :  { %45 = vst [vmem:[#allocation7] sm:$0xff] %v43_v6  ;;  %46 = vst [vmem:[#allocation7 + $0x8] sm:$0xff] %v44_v7 }
  0x1f   :  { %106 = shalt.err (!%p103_p9)
}
  0x20   :  { %56 = dma.vmem_to_hbm [thread:$0]  %s54_s19, 256, %s150_s2, [#allocation4]  }
  0x21   :  { %119 = dma.done.wait [#allocation4], 256  }
  0x22   :  { %120 = vsyncadd [#allocation4], 4294967040 }
  0x23   :  { %60 = vsyncpa [#allocation3], 1 }
  0x24   :  { %61 = vsyncpa [#allocation4], 1 }
  0x25   :  { %62 = vsyncpa [#allocation5], 1 }

</bundles_post_ra>
